<compile_context>
chip_gen: v7x
topology: tpu7x:2x2x1
jax: 0.10.0
libtpu: 0.0.40
codegen_flags: <defaults>
</compile_context>

<pallas_src>
import math
import functools

import jax
import jax.numpy as jnp
from jax.experimental import pallas as pl
from jax.experimental.pallas import tpu as pltpu


def _ramp_mask_kernel(ro_ref, mask_ref, losspart_ref, *,
                      tile_m, M, nheads, inv_ramp):
    """Pure ramp-mask streamer.

    ro_ref       : (1, 1, L)            remaining_offset row for this b
    mask_ref     : (nheads, tile_m, L)  mask slab for rows [m*tile_m, ...)
    losspart_ref : (1, 1, 1, L)         lane-wise partial loss sums for this tile
    """
    m = pl.program_id(1)
    L = mask_ref.shape[2]
    row0 = m * tile_m

    # Global M-row indices for this tile.  (Per-step iota is cheap VALU filler
    # under the write roofline; with both grid axes parallel there is no safe
    # "init-once" scratch to cache it in.)
    row_idx_i = jax.lax.broadcasted_iota(jnp.int32, (tile_m, L), 0) + row0
    row_idx = row_idx_i.astype(jnp.float32)

    ro = ro_ref[0]                                   # (1, L)
    remaining_span = ro - row_idx                    # (tile_m, L)
    mask = jnp.clip(remaining_span * inv_ramp + 1.0, 0.0, 1.0)

    # Store the same tile once per head (heads are folded into the out block).
    mask_cast = mask.astype(mask_ref.dtype)
    for h in range(nheads):                          # nheads is a small static int
        mask_ref[h] = mask_cast

    # Span-loss partial: sum over the (sublane) row axis only; keep lanes so no
    # cross-lane (XLU) reduce is needed in-kernel.  Ragged rows (>= M) of the
    # last tile are excluded so pl.cdiv grids stay exact.
    in_ramp = jnp.logical_and(mask > 0.0, mask < 1.0)
    vals = jnp.where(in_ramp, remaining_span, 0.0)
    if M % tile_m != 0:
        vals = jnp.where(row_idx_i < M, vals, 0.0)
    losspart_ref[0, 0] = jnp.sum(vals, axis=0, keepdims=True)   # (1, L)


def _pick_tile_m(M, L, nheads, block_budget_bytes=4 * 1024 * 1024):
    """Largest tile_m (multiple of 8) whose (nheads, tile_m, L) f32 block fits
    the per-block byte budget; full M if the whole thing fits."""
    bytes_per_row = nheads * L * 4
    t = block_budget_bytes // max(bytes_per_row, 1)
    t = (t // 8) * 8
    t = max(t, 8)          # floor: if even 8 rows exceed the budget, accept it
    if t >= M:
        return M           # single full-extent block (no 8-divisibility needed)
    return t               # multiple of 8; ragged last tile handled via cdiv + loss mask


def expire_span_drop(attn, memory_hid, current_counter, w, bias, *,
                     size, pre_div, ramp, loss_coef, nheads):
    B, M, L = attn.shape
    _, L2, H = memory_hid.shape
    assert L == L2

    # --- Span predictor hoisted to XLA (tiny: B*L*H MACs, fuses fine) -------
    # Mirrors the module: sigmoid((memory_hid / pre_div) @ w + b) * size.
    logits = (memory_hid.astype(jnp.float32) / float(pre_div)) @ w.astype(jnp.float32)
    logits = logits[..., 0] + bias.reshape(()).astype(jnp.float32)       # (B, L)
    max_span = jax.nn.sigmoid(logits) * float(size)
    remaining_offset = max_span - current_counter.astype(jnp.float32)    # (B, L)

    # --- Pallas kernel: HBM-write-bound mask streamer ----------------------
    tile_m = _pick_tile_m(M, L, nheads)
    num_m = pl.cdiv(M, tile_m)

    kernel = functools.partial(
        _ramp_mask_kernel,
        tile_m=tile_m, M=M, nheads=nheads, inv_ramp=1.0 / float(ramp))

    mask, loss_part = pl.pallas_call(
        kernel,
        grid=(B, num_m),
        in_specs=[
            # remaining_offset row; block index only changes with b.
            pl.BlockSpec((1, 1, L), lambda b, m: (b, 0, 0)),
        ],
        out_specs=(
            # Heads folded into the block: block index b along dim0 covers rows
            # [b*nheads, (b+1)*nheads) of the (B*nheads, M, L) output.
            pl.BlockSpec((nheads, tile_m, L), lambda b, m: (b, m, 0)),
            # Per-(b, m-tile) lane-wise loss partials.
            pl.BlockSpec((1, 1, 1, L), lambda b, m: (b, m, 0, 0)),
        ),
        out_shape=(
            jax.ShapeDtypeStruct((B * nheads, M, L), jnp.float32),
            jax.ShapeDtypeStruct((B, num_m, 1, L), jnp.float32),
        ),
        compiler_params=pltpu.CompilerParams(
            dimension_semantics=("parallel", "parallel"),
            vmem_limit_bytes=32 * 1024 * 1024,
        ),
    )(remaining_offset.reshape(B, 1, L))

    loss = loss_part.sum(axis=(1, 2, 3)) * (float(loss_coef) / (float(ramp) * float(M)))
    return mask, loss, remaining_offset


def _reference(attn, memory_hid, current_counter, w, bias, *,
               size, pre_div, ramp, loss_coef, nheads):
    B, M, L = attn.shape
    max_span = (memory_hid / pre_div) @ w + bias.reshape(1, 1, 1)   # (B, L, 1)
    max_span = jax.nn.sigmoid(max_span[..., 0]) * size              # (B, L)
    remaining_offset = max_span - current_counter
    remaining_span = remaining_offset[:, None, :] - jnp.arange(M, dtype=jnp.float32)[None, :, None]
    mask = jnp.clip(remaining_span / ramp + 1.0, 0.0, 1.0)
    ramp_mask = ((mask > 0) & (mask < 1)).astype(jnp.float32)
    loss = (remaining_span * ramp_mask).sum(axis=(1, 2)) / ramp / M * loss_coef
    mask_full = jnp.broadcast_to(mask[:, None], (B, nheads, M, L)).reshape(B * nheads, M, L)
    return mask_full, loss, remaining_offset


if __name__ == "__main__":
    # Small deterministic config consistent with the module's args.
    hid_sz = 32          # H
    attn_lim = 16        # L
    mem_sz = 8           # M
    nheads = 2
    expire_span_init_percentage = 0.1
    expire_span_pre_div = 2.0
    expire_span_ramp = 4.0
    expire_span_loss = 1e-3
    size = attn_lim      # ExpireSpanDrop(args, size=attn_lim)

    B, M, L, H = 2, mem_sz, attn_lim, hid_sz

    key = jax.random.PRNGKey(0)
    k1, k2, k3, k4 = jax.random.split(key, 4)
    attn = jax.random.normal(k1, (B, M, L), dtype=jnp.float32)
    memory_hid = jax.random.normal(k2, (B, L, H), dtype=jnp.float32)
    current_counter = jax.random.uniform(k3, (B, L), dtype=jnp.float32) * size

    # Module init uses zero weights; use small random weights here so the
    # predictor path is actually exercised numerically.  Bias as in __init__.
    w = 0.05 * jax.random.normal(k4, (H, 1), dtype=jnp.float32)
    b_val = -math.log(1.0 / expire_span_init_percentage - 1.0)
    bias = jnp.full((1,), b_val, dtype=jnp.float32)

    mask, loss, remaining_offset = expire_span_drop(
        attn, memory_hid, current_counter, w, bias,
        size=size, pre_div=expire_span_pre_div, ramp=expire_span_ramp,
        loss_coef=expire_span_loss, nheads=nheads)
    jax.block_until_ready((mask, loss, remaining_offset))

    ref_mask, ref_loss, ref_ro = _reference(
        attn, memory_hid, current_counter, w, bias,
        size=size, pre_div=expire_span_pre_div, ramp=expire_span_ramp,
        loss_coef=expire_span_loss, nheads=nheads)

    assert mask.shape == (B * nheads, M, L)
    assert loss.shape == (B,)
    assert remaining_offset.shape == (B, L)
    assert jnp.allclose(mask, ref_mask, atol=1e-5)
    assert jnp.allclose(loss, ref_loss, atol=1e-5)
    assert jnp.allclose(remaining_offset, ref_ro, atol=1e-5)

    print("KERNEL_OK")
</pallas_src>

<mosaic_0001>
module attributes {stable_mosaic.version = 11 : i64} {
  func.func @_ramp_mask_kernel(%arg0: i32, %arg1: i32, %arg2: memref<1x1x16xf32, #tpu.memory_space<vmem>>, %arg3: memref<2x8x16xf32, #tpu.memory_space<vmem>>, %arg4: memref<1x1x1x16xf32, #tpu.memory_space<vmem>>) attributes {dimension_semantics = [#tpu.dimension_semantics<parallel>, #tpu.dimension_semantics<parallel>], iteration_bounds = array<i64: 2, 1>, scalar_prefetch = 0 : i64, scratch_operands = 0 : i64, tpu.core_type = #tpu.core_type<tc>, window_params = [{transform_indices = @transform_0, window_bounds = array<i64: 1, 1, 16>}, {transform_indices = @transform_1, window_bounds = array<i64: 2, 8, 16>}, {transform_indices = @transform_2, window_bounds = array<i64: 1, 1, 1, 16>}]} {
    %c8_i32 = arith.constant 8 : i32
    %0 = arith.muli %arg1, %c8_i32 : i32
    %1 = tpu.iota {dimensions = array<i32: 0>} : vector<8x16xi32>
    %2 = vector.broadcast %0 : i32 to vector<8x16xi32>
    %3 = arith.addi %1, %2 : vector<8x16xi32>
    %4 = arith.sitofp %3 : vector<8x16xi32> to vector<8x16xf32>
    %c0 = arith.constant 0 : index
    %c0_0 = arith.constant 0 : index
    %c0_1 = arith.constant 0 : index
    %5 = vector.load %arg2[%c0, %c0_0, %c0_1] : memref<1x1x16xf32, #tpu.memory_space<vmem>>, vector<1x1x16xf32>
    %6 = vector.shape_cast %5 : vector<1x1x16xf32> to vector<1x16xf32>
    %7 = vector.broadcast %6 : vector<1x16xf32> to vector<8x16xf32>
    %8 = arith.subf %7, %4 : vector<8x16xf32>
    %cst = arith.constant 2.500000e-01 : f32
    %9 = vector.broadcast %cst : f32 to vector<8x16xf32>
    %10 = arith.mulf %8, %9 : vector<8x16xf32>
    %cst_2 = arith.constant 1.000000e+00 : f32
    %11 = vector.broadcast %cst_2 : f32 to vector<8x16xf32>
    %12 = arith.addf %10, %11 : vector<8x16xf32>
    %cst_3 = arith.constant 0.000000e+00 : f32
    %cst_4 = arith.constant 1.000000e+00 : f32
    %13 = vector.broadcast %cst_3 : f32 to vector<8x16xf32>
    %14 = arith.maximumf %13, %12 : vector<8x16xf32>
    %15 = vector.broadcast %cst_4 : f32 to vector<8x16xf32>
    %16 = arith.minimumf %15, %14 : vector<8x16xf32>
    %c0_5 = arith.constant 0 : index
    %c0_6 = arith.constant 0 : index
    %c0_7 = arith.constant 0 : index
    %17 = vector.load %arg3[%c0_5, %c0_6, %c0_7] : memref<2x8x16xf32, #tpu.memory_space<vmem>>, vector<1x8x16xf32>
    %18 = vector.shape_cast %17 : vector<1x8x16xf32> to vector<8x16xf32>
    %19 = vector.shape_cast %16 : vector<8x16xf32> to vector<1x8x16xf32>
    tpu.vector_store %arg3[%c0_5, %c0_6, %c0_7], %19 {strides = array<i32>} : memref<2x8x16xf32, #tpu.memory_space<vmem>>, vector<1x8x16xf32>,
    %c1 = arith.constant 1 : index
    %c0_8 = arith.constant 0 : index
    %c0_9 = arith.constant 0 : index
    %20 = vector.load %arg3[%c1, %c0_8, %c0_9] : memref<2x8x16xf32, #tpu.memory_space<vmem>>, vector<1x8x16xf32>
    %21 = vector.shape_cast %20 : vector<1x8x16xf32> to vector<8x16xf32>
    %22 = vector.shape_cast %16 : vector<8x16xf32> to vector<1x8x16xf32>
    tpu.vector_store %arg3[%c1, %c0_8, %c0_9], %22 {strides = array<i32>} : memref<2x8x16xf32, #tpu.memory_space<vmem>>, vector<1x8x16xf32>,
    %cst_10 = arith.constant 0.000000e+00 : f32
    %23 = vector.broadcast %cst_10 : f32 to vector<8x16xf32>
    %24 = arith.cmpf ogt, %16, %23 : vector<8x16xf32>
    %cst_11 = arith.constant 1.000000e+00 : f32
    %25 = vector.broadcast %cst_11 : f32 to vector<8x16xf32>
    %26 = arith.cmpf olt, %16, %25 : vector<8x16xf32>
    %27 = arith.andi %24, %26 : vector<8x16xi1>
    %cst_12 = arith.constant 0.000000e+00 : f32
    %28 = vector.broadcast %cst_12 : f32 to vector<8x16xf32>
    %29 = arith.select %27, %8, %28 : vector<8x16xi1>, vector<8x16xf32>
    %cst_13 = arith.constant dense<0.000000e+00> : vector<16xf32>
    %30 = vector.multi_reduction <add>, %29, %cst_13 [0] : vector<8x16xf32> to vector<16xf32>
    %31 = vector.shape_cast %30 : vector<16xf32> to vector<1x16xf32>
    %c0_14 = arith.constant 0 : index
    %c0_15 = arith.constant 0 : index
    %c0_16 = arith.constant 0 : index
    %c0_17 = arith.constant 0 : index
    %32 = vector.load %arg4[%c0_14, %c0_15, %c0_16, %c0_17] : memref<1x1x1x16xf32, #tpu.memory_space<vmem>>, vector<1x1x1x16xf32>
    %33 = vector.shape_cast %32 : vector<1x1x1x16xf32> to vector<1x16xf32>
    %34 = vector.shape_cast %31 : vector<1x16xf32> to vector<1x1x1x16xf32>
    tpu.vector_store %arg4[%c0_14, %c0_15, %c0_16, %c0_17], %34 {strides = array<i32>} : memref<1x1x1x16xf32, #tpu.memory_space<vmem>>, vector<1x1x1x16xf32>,
    return
  }
  func.func @transform_0(%arg0: i32, %arg1: i32) -> (i32, i32, i32) {
    %c0_i32 = arith.constant 0 : i32
    %c0_i32_0 = arith.constant 0 : i32
    %c0_i32_1 = arith.constant 0 : i32
    return %arg0, %c0_i32, %c0_i32_0 : i32, i32, i32
  }
  func.func @transform_1(%arg0: i32, %arg1: i32) -> (i32, i32, i32) {
    %c0_i32 = arith.constant 0 : i32
    %c0_i32_0 = arith.constant 0 : i32
    return %arg0, %arg1, %c0_i32 : i32, i32, i32
  }
  func.func @transform_2(%arg0: i32, %arg1: i32) -> (i32, i32, i32, i32) {
    %c0_i32 = arith.constant 0 : i32
    %c0_i32_0 = arith.constant 0 : i32
    %c0_i32_1 = arith.constant 0 : i32
    return %arg0, %arg1, %c0_i32, %c0_i32_0 : i32, i32, i32, i32
  }
}

</mosaic_0001>

<bundles_post_ra>
// kernel: tpu_custom_call.1
= control target key start
LH: loop header
LB: loop body
LE: loop exit
PB: predicated region body
PF: predicated region fallthrough
CT: control target
= control target key end

     0   :  { %8 = vsyncpa [#allocation3], 0  ;;  %s826_s0 = inlined_call_operand.hbm [shape: f32[2,1,16], index: 0, kind: input, shape index: {}]   ;;  %s827_s1 = inlined_call_operand.hbm [shape: f32[4,8,16], index: 1, kind: output, shape index: {0}]   ;;  %s828_s2 = inlined_call_operand.hbm [shape: f32[2,1,1,16], index: 2, kind: output, shape index: {1}]  }
   0x1   :  { %10 = vsyncpa [#allocation3 + $0x1], 0 }
   0x2   :  { %11 = vsyncpa [#allocation4], 0 }
   0x3   :  { %13 = vsyncpa [#allocation4 + $0x1], 0 }
   0x4   :  { %14 = vsyncpa [#allocation7], 0 }
   0x5   :  { %16 = vsyncpa [#allocation7 + $0x1], 0  ;;  %s611_s9 = smov 0   ;;  %s613_s10 = smov 0  }
   0x6   :  { %s615_s11 = smov 0   ;;  %s617_s12 = smov 0  }
   0x7   :  { %s619_s13 = smov 0   ;;  %s621_s14 = smov 0  }
   0x8 LB: > { %s360_s15 = sadd.s32 4294967295, %s589_s14   ;;  %s361_s16 = sadd.s32 4294967294, %s589_s14   ;;  %s589_s14 = sphi %s621_s14, %s22_s14   ;;  %s585_s13 = sphi %s619_s13, %s846_s13   ;;  %s581_s12 = sphi %s617_s12, %s845_s12   ;;  %s577_s11 = sphi %s615_s11, %s844_s11   ;;  %s573_s10 = sphi %s613_s10, %s843_s10   ;;  %s569_s9 = sphi %s611_s9, %s842_s9  }
   0x9   : > { %s34_s17 = sadd.s32 1, %s585_s13  ;;  %s41_s18 = sadd.s32 1, %s577_s11 }
   0xa   : > { %p36_p0 = scmp.ge.s32.totalorder %s34_s17, 2  ;;  %p48_p1 = scmp.ne.s32.totalorder %s577_s11, %s573_s10 }
   0xb   : > { %p49_p2 = scmp.eq.s32.totalorder %s589_s14, 0  ;;  %p54_p3 = scmp.ne.s32.totalorder %s573_s10, %s569_s9 }
   0xc   : > { %s848_s17 = smov (%p36_p0, %s34_s17), 0  ;;  %p55_p5 = scmp.eq.s32.totalorder %s360_s15, 0 }
   0xd   : > { %p652_p4 = por %p49_p2, %p48_p1  ;;  %s38_s20 = ssub.s32 %s585_s13, %s848_s17 }
   0xe   : > { %p80_p6 = scmp.eq.s32.totalorder %s360_s15, 1  ;;  %p39_p7 = scmp.eq.s32.totalorder %s38_s20, 0 }
   0xf   : > { %p658_p8 = por %p55_p5, %p54_p3  ;;  %p86_p10 = scmp.eq.s32.totalorder %s361_s16, 1 }
  0x10   : > { %p662_p9 = por %p80_p6, %p48_p1  ;;  %p393_p13 = scmp.lt.s32.totalorder %s589_s14, 2 }
  0x11   : > { %s667_s23 = scalar_select %p39_p7, %s577_s11, %s41_s18  }
  0x12   : > { %s832_s22 = scalar_select %p662_p9, 1, 0 }
  0x13   : > { %p669_p11 = por %p86_p10, %p54_p3  ;;  %s134_s25 = sand.u32 1, %s577_s11  }
  0x14   : > { %s364_s26 = sshll.u32 %s585_s13, 4  ;;  %s137_s27 = scalar_lea.vmem [#allocation2], %s134_s25 }
  0x15   : > { %s833_s24 = scalar_select %p669_p11, 1, 0 }
  0x16   : > { %s144_s28 = sshll.u32 %s137_s27, 4  ;;  %s680_s3 = scalar_lea.hbm %s826_s0, %s364_s26  ;;  %s682_s28 = int_to_ptr.vmem [resolvable:$true] %s144_s28 }
  0x17   : > { %p686_p0 = pnand %p393_p13, %p652_p4  ;;  %s135_s5 = scalar_lea.sflag [#allocation3], %s134_s25 }
  0x18   : > { %s445_s6 = scalar_lea.hbm %s680_s3, 16  ;;  %s450_s15 = scalar_lea.hbm %s826_s0, 32 }
  0x19   : > { %p446_p3 = scmp.ne.s32.totalorder %s680_s3, %s445_s6  ;;  %p447_p5 = pneg %p686_p0 }
  0x1a   : > { %p451_p4 = scmp.lt.u32.totalorder %s680_s3, %s826_s0  ;;  %p452_p10 = scmp.lt.u32.totalorder %s450_s15, %s445_s6 }
  0x1b   : > { %p448_p6 = pnand %p447_p5, %p446_p3  ;;  %p454_p12 = scmp.lt.u32.totalorder %s445_s6, %s680_s3 }
  0x1c   : > { %p453_p13 = por %p452_p10, %p451_p4 }
  0x1d   : > { %p449_p7 = pneg %p448_p6 }
  0x1e   : > { %p455_p1 = por %p454_p12, %p453_p13 }
  0x20   : > { %p456_p2 = pnand %p455_p1, %p449_p7 }
  0x22   : > { %459 = shalt.err (!%p456_p2)
}
  0x23   : > { %s460_s19 = scalar_lea.vmem %s682_s28, 16  ;;  %s591_s20 = smov [#allocation2]  }
  0x24   : > { %p461_p3 = scmp.ne.s32.totalorder %s682_s28, %s460_s19  ;;  %s465_s25 = sshll.u32 %s591_s20, 4  ;;  %s466_s25 = int_to_ptr.vmem [resolvable:$false] %s465_s25 }
  0x25   : > { %s467_s26 = scalar_lea.vmem %s466_s25, 32  ;;  %p468_p9 = scmp.lt.s32.totalorder %s682_s28, %s466_s25 }
  0x26   : > { %p463_p6 = pnand %p461_p3, %p447_p5  ;;  %p469_p4 = scmp.lt.s32.totalorder %s467_s26, %s460_s19 }
  0x28   : > { %p464_p11 = pneg %p463_p6  ;;  %p470_p10 = por %p469_p4, %p468_p9 }
  0x2a   : > { %p471_p12 = pnand %p470_p10, %p464_p11 }
  0x2c   : > { %474 = shalt.err (!%p471_p12)
}
  0x2d   : > { %385 = dma.hbm_to_vmem [thread:$0]  (!%p686_p0), %s680_s3, 16, %s682_s28, %s135_s5  }
  0x2e   : > { %p835_p1 = scmp.lt.s32.totalorder %s589_s14, 3  ;;  %p836_p2 = scmp.ge.s32.totalorder %s589_s14, 1 }
  0x30   : > { %p150_p5 = pnand %p836_p2, %p835_p1 }
  0x31   : > { %s722_s27 = sand.u32 (!%p150_p5), 1, %s573_s10  }
  0x32   : > { %153 = sbr.rel (%p150_p5) target bundleno = 116 (0x74), region = 24  ;;  %s156_s29 = scalar_lea.sflag (!%p150_p5), [#allocation3], %s722_s27 }
  0x33   : > { %s158_s30 = scalar_lea.vmem (!%p150_p5), [#allocation2], %s722_s27 }
  0x39   : > { %556 = dma.done.wait (%p658_p8), %s156_s29, 16  }
  0x3a   : > { %558 = vsyncadd (%p658_p8), %s156_s29, 4294967280  ;;  %v184_v0 = vlaneseq  ;;  %s366_s28 = sshll.u32 %s722_s27, 4  ;;  %v367_v3 = vld [vmem:[%s158_s30] ss:$0 sm:$0xff]  ;;  %s375_s5 = sshll.u32 %s581_s12, 8  ;;  %vm201_vm0 = vcmask 130048  }
  0x3b   : > { %s175_s3 = scalar_lea.vmem [#allocation5], %s366_s28  ;;  %s737_s7 = scalar_lea.hbm %s827_s1, %s375_s5 }
  0x3c   : > { %v185_v1 = vshrl.u32 %v184_v0, 7  ;;  %s237_s4 = sshll.u32 %s175_s3, 4  ;;  %s219_s8 = scalar_lea.sflag [#allocation4], %s722_s27  ;;  %s732_s4 = int_to_ptr.vmem [resolvable:$true] %s237_s4 }
  0x3d   : > { %s475_s15 = scalar_lea.vmem %s732_s4, 256  ;;  %p839_p9 = scmp.ne.s32.totalorder %s832_s22, 0 }
  0x3e   : > { %v188_v2 = vcvt.s32.f32 %v185_v1  ;;  %p476_p8 = scmp.ne.s32.totalorder %s732_s4, %s475_s15  ;;  %s592_s16 = smov [#allocation5]  }
  0x3f   : > { %s479_s18 = sshll.u32 %s592_s16, 4  ;;  %s480_s18 = int_to_ptr.vmem [resolvable:$false] %s479_s18 }
  0x40   : > { %v196_v4 = vsub.f32 %v367_v3, %v188_v2  ;;  %p477_p11 = pnand %p476_p8, %p839_p9  ;;  %s481_s19 = scalar_lea.vmem %s480_s18, 512 }
  0x41   : > { %p482_p7 = scmp.lt.s32.totalorder %s732_s4, %s480_s18  ;;  %p483_p13 = scmp.lt.s32.totalorder %s481_s19, %s475_s15 }
  0x42   : > { %v197_v5 = vmul.f32 0.25, %v196_v4  ;;  %p478_p0 = pneg %p477_p11 }
  0x43   : > { %p484_p3 = por %p483_p13, %p482_p7 }
  0x44   : > { %v198_v6 = vadd.f32 1.0, %v197_v5 }
  0x45   : > { %p485_p6 = pnand %p484_p3, %p478_p0 }
  0x46   : > { %v199_v7 = vmax.f32 %v198_v6, 0.0 }
  0x48   : > { %v200_v8 = vmin.f32 %v199_v7, 1.0 }
  0x4a   : > { %202 = vst.msk [vmem:[%s175_s3] sm:$0xff] %vm201_vm0, %v200_v8  ;;  %vm205_vm1 = vcmp.gt.f32.partialorder %v200_v8, 0.0  ;;  %vm206_vm2 = vcmp.lt.f32.partialorder %v200_v8, 1.0  ;;  %368 = vst.msk [vmem:[%s175_s3 + $0x8] sm:$0xff] %vm201_vm0, %v200_v8 }
  0x4b   : > { %vm741_vm3 = vmand %vm205_vm1, %vm206_vm2 }
  0x4c   : > { %488 = shalt.err (!%p485_p6)
}
  0x4d   : > { %s489_s20 = scalar_lea.hbm %s737_s7, 256  ;;  %s493_s29 = scalar_lea.hbm %s827_s1, 512 }
  0x4e   : > { %p490_p4 = scmp.ne.s32.totalorder %s737_s7, %s489_s20  ;;  %p494_p1 = scmp.lt.u32.totalorder %s737_s7, %s827_s1 }
  0x4f   : > { %p495_p2 = scmp.lt.u32.totalorder %s493_s29, %s489_s20  ;;  %p497_p8 = scmp.lt.u32.totalorder %s489_s20, %s737_s7 }
  0x50   : > { %p491_p10 = pnand %p490_p4, %p839_p9 }
  0x51   : > { %p496_p5 = por %p495_p2, %p494_p1 }
  0x52   : > { %p492_p12 = pneg %p491_p10 }
  0x53   : > { %p498_p11 = por %p497_p8, %p496_p5 }
  0x55   : > { %p499_p0 = pnand %p498_p11, %p492_p12 }
  0x57   : > { %502 = shalt.err (!%p499_p0)
}
  0x58   : > { %s593_s3 = smov 128   ;;  %s594_s5 = smov 8   ;;  %v208_v10 = vsel %vm741_vm3, %v196_v4, 0.0  ;;  %vm216_vm4 = vcmask 122880  }
  0x59   : > { %378 = dma.vmem_to_hbm [thread:$0]  (%p839_p9), %s732_s4, 256, %s737_s7, %s219_s8, %s593_s3, %s593_s3, %s594_s5   ;;  %v209_v11 = vsel %vm201_vm0, %v208_v10, 0.0 }
  0x5a   : > { %v210_v12 = vrot.slane %v209_v11, 4  ;;  %s181_s21 = scalar_lea.vmem [#allocation6], %s722_s27  ;;  %s372_s15 = sshll.u32 %s581_s12, 4 }
  0x5b   : > { %s254_s6 = sshll.u32 %s181_s21, 4  ;;  %s779_s8 = scalar_lea.hbm %s828_s2, %s372_s15  ;;  %s774_s6 = int_to_ptr.vmem [resolvable:$true] %s254_s6 }
  0x5c   : > { %v211_v13 = vadd.f32 %v210_v12, %v209_v11  ;;  %s224_s16 = scalar_lea.sflag [#allocation7], %s722_s27  ;;  %s503_s18 = scalar_lea.vmem %s774_s6, 16 }
  0x5d   : > { %p504_p7 = scmp.ne.s32.totalorder %s774_s6, %s503_s18  ;;  %s595_s12 = smov [#allocation6]  }
  0x5e   : > { %v212_v14 = vrot.slane %v211_v13, 2  ;;  %s507_s19 = sshll.u32 %s595_s12, 4  ;;  %s508_s19 = int_to_ptr.vmem [resolvable:$false] %s507_s19 }
  0x5f   : > { %p505_p13 = pnand %p504_p7, %p839_p9  ;;  %s509_s20 = scalar_lea.vmem %s508_s19, 32 }
  0x60   : > { %v213_v15 = vadd.f32 %v212_v14, %v211_v13  ;;  %p510_p6 = scmp.lt.s32.totalorder %s774_s6, %s508_s19  ;;  %p511_p4 = scmp.lt.s32.totalorder %s509_s20, %s503_s18 }
  0x61   : > { %p506_p3 = pneg %p505_p13 }
  0x62   : > { %v214_v16 = vrot.slane %v213_v15, 1  ;;  %p512_p10 = por %p511_p4, %p510_p6 }
  0x64   : > { %v215_v17 = vadd.f32 %v214_v16, %v213_v15  ;;  %p513_p12 = pnand %p512_p10, %p506_p3 }
  0x66   : > { %217 = vst.msk [vmem:[%s181_s21] sm:$0x1] %vm216_vm4, %v215_v17 }
  0x67   : > { %516 = shalt.err (!%p513_p12)
}
  0x68   : > { %s517_s27 = scalar_lea.hbm %s779_s8, 16  ;;  %s521_s29 = scalar_lea.hbm %s828_s2, 32 }
  0x69   : > { %p518_p1 = scmp.ne.s32.totalorder %s779_s8, %s517_s27  ;;  %p522_p8 = scmp.lt.u32.totalorder %s779_s8, %s828_s2 }
  0x6a   : > { %p523_p11 = scmp.lt.u32.totalorder %s521_s29, %s517_s27  ;;  %p525_p7 = scmp.lt.u32.totalorder %s517_s27, %s779_s8 }
  0x6b   : > { %p519_p2 = pnand %p518_p1, %p839_p9 }
  0x6c   : > { %p524_p0 = por %p523_p11, %p522_p8 }
  0x6d   : > { %p520_p5 = pneg %p519_p2 }
  0x6e   : > { %p526_p13 = por %p525_p7, %p524_p0 }
  0x70   : > { %p527_p3 = pnand %p526_p13, %p520_p5 }
  0x72   : > { %530 = shalt.err (!%p527_p3)
}
  0x73   : > { %379 = dma.vmem_to_hbm [thread:$0]  (%p839_p9), %s774_s6, 16, %s779_s8, %s224_s16  }
  0x74 PF: > { %s266_s3 = sand.u32 1, %s569_s9   ;;  %p840_p6 = scmp.ne.s32.totalorder %s833_s24, 0 }
  0x75   : > { %p841_p4 = scmp.ge.s32.totalorder %s589_s14, 2  ;;  %s267_s5 = scalar_lea.sflag [#allocation4], %s266_s3 }
  0x77   : > { %p387_p10 = pnand %p841_p4, %p840_p6 }
  0x79   : > { %560 = dma.done.wait (!%p387_p10), %s267_s5, 256  }
  0x7a   : > { %562 = vsyncadd (!%p387_p10), %s267_s5, 4294967040  ;;  %s276_s21 = scalar_lea.sflag [#allocation7], %s266_s3 }
  0x7b   : > { %564 = dma.done.wait (!%p387_p10), %s276_s21, 16  }
  0x7c   : > { %566 = vsyncadd (!%p387_p10), %s276_s21, 4294967280  ;;  %s22_s14 = sadd.s32 1, %s589_s14   ;;  %s842_s9 = smov %s573_s10 }
  0x7d   : > { %p19_p12 = scmp.ge.s32.totalorder %s22_s14, 4   ;;  %s843_s10 = smov %s577_s11 }
  0x7e   : > { %s844_s11 = smov %s667_s23  ;;  %s845_s12 = smov %s585_s13 }
  0x7f   : > { %s846_s13 = smov %s848_s17  ;;  %21 = sbr.rel (!%p19_p12) target bundleno = 8 (0x8), region = 87 }
  0x86   :  { %280 = vsyncpa [#allocation3], 1 }
  0x87   :  { %282 = vsyncpa [#allocation3 + $0x1], 1 }
  0x88   :  { %283 = vsyncpa [#allocation4], 1 }
  0x89   :  { %285 = vsyncpa [#allocation4 + $0x1], 1 }
  0x8a   :  { %286 = vsyncpa [#allocation7], 1 }
  0x8b   :  { %288 = vsyncpa [#allocation7 + $0x1], 1 }

</bundles_post_ra>
